<compile_context>
chip_gen: v5e
topology: v5e:2x2
jax: 0.10.0
libtpu: 0.0.40
codegen_flags: <defaults>
</compile_context>

<pallas_src>
import jax
import jax.numpy as jnp
from jax.experimental import pallas as pl
from jax.experimental.pallas import tpu as pltpu


# ----------------------------------------------------------------------------
# Default forward: pure identity, no kernel, no copy (review's top change).
# ----------------------------------------------------------------------------
def labeled_components_forward(components: jax.Array, labels: jax.Array):
    """Pallas-free equivalent of LabeledComponents.forward() (identity)."""
    return components, labels


# ----------------------------------------------------------------------------
# Optional Pallas "fusion shell" path.
# ----------------------------------------------------------------------------
def _identity_copy_kernel(comp_ref, comp_out_ref):
    # Identity on the components tile. Placeholder body for future fused
    # compute; today it only copies the tile through VMEM.
    comp_out_ref[...] = comp_ref[...]


def _sublane_packing(itemsize: int) -> int:
    # f32 -> 8, bf16 -> 16, int8/fp8 -> 32 rows per packed sublane group.
    return max(8, (8 * 4) // max(1, itemsize))


def _vmem_budget_bytes() -> tuple[int, int]:
    """Return (per_buffer_budget, vmem_limit) sized to the TPU generation.

    4 live buffers (double-buffered in + out) must fit comfortably inside the
    scoped VMEM limit we request; per-buffer budget scales with physical VMEM
    (64 MiB on v7x, 128 MiB on v5e/v6e)."""
    per_buffer = 2 * 1024 * 1024          # conservative fallback (8 MiB total)
    try:
        vmem_cap = pltpu.get_tpu_info().vmem_capacity_bytes
        # 128 MiB parts -> 8 MiB/buffer, 64 MiB (v7x, per-TC) -> 4 MiB/buffer.
        per_buffer = max(2 * 1024 * 1024, min(8 * 1024 * 1024, vmem_cap // 16))
    except Exception:
        pass
    # Headroom: 4 live buffers + internal scratch. Explicitly raising the
    # scoped limit avoids tripping v5e's 16 MiB default when tiles are large.
    vmem_limit = 6 * per_buffer
    return per_buffer, vmem_limit


def _pick_tile_rows(n: int, d: int, itemsize: int, per_buffer_bytes: int) -> int:
    """Largest row tile whose buffer fits the per-buffer byte budget.

    No artificial row cap (review): tile size is determined by bytes only, so
    large n means fewer grid steps and longer, fully contiguous DMAs."""
    packing = _sublane_packing(itemsize)
    rows = per_buffer_bytes // max(1, d * itemsize)
    rows = max(packing, (rows // packing) * packing)
    if rows >= n:
        return n                           # single full-extent block
    return rows


def labeled_components_forward_kernel(components: jax.Array, labels: jax.Array):
    """Fusion-shell version of forward(): routes components through a tiled
    Pallas identity kernel. Labels bypass the kernel (constant buffer)."""
    n, d = components.shape
    per_buffer, vmem_limit = _vmem_budget_bytes()
    tm = _pick_tile_rows(n, d, components.dtype.itemsize, per_buffer)
    grid = (pl.cdiv(n, tm),)

    # TODO(synk): if feature_dim ever drops well below 128, reshape (n, d) to a
    # lane-dense (n*d//128, 128) slab in this wrapper before tiling.
    comp_out = pl.pallas_call(
        _identity_copy_kernel,
        out_shape=jax.ShapeDtypeStruct((n, d), components.dtype),
        grid=grid,
        in_specs=[pl.BlockSpec((tm, d), lambda i: (i, 0))],
        out_specs=pl.BlockSpec((tm, d), lambda i: (i, 0)),
        compiler_params=pltpu.CompilerParams(
            # Row tiles are independent -> shards across both TCs on v7x;
            # harmless no-op on single-TC v5e/v6e.
            dimension_semantics=("parallel",),
            vmem_limit_bytes=vmem_limit,
        ),
    )(components)

    # Labels: unadaptable registered buffer; forward() just returns it.
    return comp_out, labels


# ----------------------------------------------------------------------------
# Deterministic stand-ins for the module's initializers.
# ----------------------------------------------------------------------------
def build_labeled_components(distribution: dict, feature_dim: int, key):
    """distribution: {class_label: count}. Components ~ N(0,1) (like
    RandomNormalCompInitializer); labels = each class repeated `count` times
    (LabelsInitializer)."""
    num_components = sum(distribution.values())
    components = jax.random.normal(key, (num_components, feature_dim),
                                   dtype=jnp.float32)
    labels = jnp.concatenate([
        jnp.full((count,), label, dtype=jnp.int32)
        for label, count in sorted(distribution.items())
    ])
    return components, labels


if __name__ == "__main__":
    key = jax.random.PRNGKey(0)

    # Small, module-consistent shapes: 3 classes with counts {0:3, 1:2, 2:3}
    # -> 8 components; feature_dim=128 keeps stores lane-dense.
    distribution = {0: 3, 1: 2, 2: 3}
    feature_dim = 128

    components, labels = build_labeled_components(distribution, feature_dim, key)
    expected_components = jax.device_get(components)
    expected_labels = jax.device_get(labels)

    # 1) Default (recommended) path: zero-cost identity.
    fast_comp, fast_lbl = labeled_components_forward(components, labels)
    assert fast_comp is components and fast_lbl is labels

    # 2) Pallas fusion-shell path: runs the tiled identity kernel once.
    comp_out, lbl_out = labeled_components_forward_kernel(components, labels)
    comp_out = jax.block_until_ready(comp_out)
    lbl_out = jax.block_until_ready(lbl_out)

    assert comp_out.shape == expected_components.shape
    assert comp_out.dtype == expected_components.dtype
    assert lbl_out.shape == expected_labels.shape
    assert lbl_out.dtype == expected_labels.dtype
    assert bool(jnp.all(comp_out == jnp.asarray(expected_components)))
    assert bool(jnp.all(lbl_out == jnp.asarray(expected_labels)))

    print("KERNEL_OK")
</pallas_src>

<mosaic_0001>
module attributes {stable_mosaic.version = 11 : i64} {
  func.func @_identity_copy_kernel(%arg0: i32, %arg1: memref<8x128xf32, #tpu.memory_space<vmem>>, %arg2: memref<8x128xf32, #tpu.memory_space<vmem>>) attributes {dimension_semantics = [#tpu.dimension_semantics<parallel>], iteration_bounds = array<i64: 1>, scalar_prefetch = 0 : i64, scratch_operands = 0 : i64, tpu.core_type = #tpu.core_type<tc>, window_params = [{transform_indices = @transform_0, window_bounds = array<i64: 8, 128>}, {transform_indices = @transform_1, window_bounds = array<i64: 8, 128>}]} {
    %c0 = arith.constant 0 : index
    %c0_0 = arith.constant 0 : index
    %0 = vector.load %arg1[%c0, %c0_0] : memref<8x128xf32, #tpu.memory_space<vmem>>, vector<8x128xf32>
    %c0_1 = arith.constant 0 : index
    %c0_2 = arith.constant 0 : index
    %1 = vector.load %arg2[%c0_1, %c0_2] : memref<8x128xf32, #tpu.memory_space<vmem>>, vector<8x128xf32>
    tpu.vector_store %arg2[%c0_1, %c0_2], %0 {strides = array<i32>} : memref<8x128xf32, #tpu.memory_space<vmem>>, vector<8x128xf32>,
    return
  }
  func.func @transform_0(%arg0: i32) -> (i32, i32) {
    %c0_i32 = arith.constant 0 : i32
    %c0_i32_0 = arith.constant 0 : i32
    return %arg0, %c0_i32 : i32, i32
  }
  func.func @transform_1(%arg0: i32) -> (i32, i32) {
    %c0_i32 = arith.constant 0 : i32
    %c0_i32_0 = arith.constant 0 : i32
    return %arg0, %c0_i32 : i32, i32
  }
}

</mosaic_0001>

<bundles_post_ra>
// kernel: tpu_custom_call.1
= control target key start
LH: loop header
LB: loop body
LE: loop exit
PB: predicated region body
PF: predicated region fallthrough
CT: control target
= control target key end

     0   :  { %6 = vsyncpa [#allocation3], 0  ;;  %s114_s0 = inlined_call_operand.hbm [shape: f32[8,128], index: 0, kind: input, shape index: {}]   ;;  %s115_s1 = inlined_call_operand.hbm [shape: f32[8,128], index: 1, kind: output, shape index: {}]  }
   0x1   :  { %7 = vsyncpa [#allocation4], 0  ;;  %s13_s8 = sshll.u32 %s114_s0, 4  ;;  %s96_s9 = smov [#allocation2]   ;;  %s14_s8 = int_to_ptr.hbm [resolvable:$true] %s13_s8 }
   0x2   :  { %s15_s10 = sshll.u32 %s96_s9, 4  ;;  %s16_s10 = int_to_ptr.vmem [resolvable:$true] %s15_s10 }
   0x3   :  { %18 = dma.hbm_to_vmem [thread:$0]  %s14_s8, 128, %s16_s10, [#allocation3]  }
   0x4   :  { %92 = dma.done.wait [#allocation3], 128  }
   0x5   :  { %93 = vsyncadd [#allocation3], 4294967168  ;;  %s97_s11 = smov [#allocation5]   ;;  %s32_s15 = sshll.u32 %s115_s1, 4  ;;  %v23_v0 = vld [vmem:[#allocation2] sm:$0xff]  ;;  %s33_s15 = int_to_ptr.hbm [resolvable:$true] %s32_s15 }
   0x6   :  { %s30_s12 = sshll.u32 %s97_s11, 4  ;;  %24 = vst [vmem:[#allocation5] sm:$0xff] %v23_v0  ;;  %s31_s12 = int_to_ptr.vmem [resolvable:$true] %s30_s12 }
   0x7   :  { %35 = dma.vmem_to_hbm [thread:$0]  %s31_s12, 128, %s33_s15, [#allocation4]  }
   0x8   :  { %94 = dma.done.wait [#allocation4], 128  }
   0x9   :  { %95 = vsyncadd [#allocation4], 4294967168 }
   0xa   :  { %40 = vsyncpa [#allocation3], 1 }
   0xb   :  { %41 = vsyncpa [#allocation4], 1 }

</bundles_post_ra>
